<compile_context>
chip_gen: v7x
topology: tpu7x:2x2x1
jax: 0.10.0
libtpu: 0.0.40
codegen_flags: <defaults>
</compile_context>

<pallas_src>
import functools

import jax
import jax.numpy as jnp
from jax.experimental import pallas as pl
from jax.experimental.pallas import tpu as pltpu


_TARGET_BLOCK_BYTES = 4 * 1024 * 1024   # per input block (Pallas double-buffers it)
_MAX_TILE_R = 1024                      # rows per tile cap (feedback: 512-2048)
_SPATIAL_TILE = 2048                    # lanes per spatial tile (multiple of 128)
_SPATIAL_TILE_THRESHOLD = 4096          # tile the spatial axis above this H*W


def _ipow(x, n: int):
    """x**n for a static positive integer n via multiplies (VPU only, no EUP)."""
    assert n >= 1
    result = None
    base = x
    while n:
        if n & 1:
            result = base if result is None else result * base
        n >>= 1
        if n:
            base = base * base
    return result


def _finalize(m, p_ref, p_int):
    """m ** (1/p); per-row only, so the pow cost is negligible."""
    if p_int == 1:
        return m
    if p_int == 2:
        return jnp.sqrt(m)
    if p_int is not None:
        return jnp.power(m, 1.0 / p_int)
    return jnp.power(m, 1.0 / p_ref[0])


def _gem_kernel(p_ref, x_ref, o_ref, *, eps, clamp, inv_s, p_int):
    """Single-pass kernel: one row tile covers the full spatial extent."""
    x = x_ref[...].astype(jnp.float32)
    if clamp:
        x = jnp.maximum(x, eps)
    if p_int is not None:
        xp = _ipow(x, p_int)
    else:
        # NOTE: with clamp=False, jnp.power on a traced p lowers to
        # exp(p*log(x)); non-positive inputs then produce -inf/NaN.
        p = p_ref[0]
        xp = jnp.power(x, p)
    m = jnp.sum(xp, axis=-1, keepdims=True) * inv_s
    o_ref[...] = _finalize(m, p_ref, p_int).astype(o_ref.dtype)


def _gem_acc_kernel(p_ref, x_ref, o_ref, acc_ref, *, eps, clamp, inv_s, p_int,
                    s_total, tile_s):
    """Accumulator kernel for large H*W: 2-D grid (rows, spatial), P3 pattern."""
    s_idx = pl.program_id(1)

    @pl.when(s_idx == 0)
    def _():
        acc_ref[...] = jnp.zeros_like(acc_ref)

    x = x_ref[...].astype(jnp.float32)
    if clamp:
        x = jnp.maximum(x, eps)
    if p_int is not None:
        xp = _ipow(x, p_int)
    else:
        xp = jnp.power(x, p_ref[0])

    if s_total % tile_s != 0:
        # Mask out padded lanes of the partial last spatial tile.
        start = s_idx * tile_s
        lane = jax.lax.broadcasted_iota(jnp.int32, xp.shape, 1)
        xp = jnp.where(lane < (s_total - start), xp, 0.0)

    acc_ref[...] += jnp.sum(xp, axis=-1, keepdims=True)

    @pl.when(s_idx == pl.num_programs(1) - 1)
    def _():
        m = acc_ref[...] * inv_s
        o_ref[...] = _finalize(m, p_ref, p_int).astype(o_ref.dtype)


def gem_pool(x: jax.Array, p, eps: float = 1e-6, clamp: bool = True,
             max_tile_r: int = _MAX_TILE_R) -> jax.Array:
    """GeM pooling. x: (N, C, H, W). p: learnable exponent (shape (1,)) or float.
    Returns (N, C)."""
    N, C, H, W = x.shape
    R, S = N * C, H * W
    xf = x.reshape(R, S)

    # --- exponent specialization ------------------------------------------
    p_arr = jnp.asarray(p, dtype=jnp.float32).reshape((1,))
    p_int = None
    try:
        pv = float(p_arr[0])                 # fails if p is traced -> dyn path
        if 1.0 <= pv <= 16.0 and pv == round(pv):
            p_int = int(round(pv))
    except Exception:
        p_int = None

    # --- tile sizing against a small VMEM budget (v7x-safe) ----------------
    if S >= _SPATIAL_TILE_THRESHOLD:
        tile_s = _SPATIAL_TILE
        n_s = pl.cdiv(S, tile_s)
    else:
        tile_s = S
        n_s = 1
    padded_tile_s = max(((tile_s + 127) // 128) * 128, 128)
    bytes_per_row = padded_tile_s * xf.dtype.itemsize
    tile_r = max(8, min(max_tile_r, (_TARGET_BLOCK_BYTES // bytes_per_row) // 8 * 8))
    if R <= tile_r:
        tile_r = R                           # full extent is always legal
    n_r = pl.cdiv(R, tile_r)

    if n_s == 1:
        kernel = functools.partial(_gem_kernel, eps=eps, clamp=clamp,
                                   inv_s=1.0 / S, p_int=p_int)
        out = pl.pallas_call(
            kernel,
            out_shape=jax.ShapeDtypeStruct((R, 1), x.dtype),
            grid=(n_r,),
            in_specs=[
                pl.BlockSpec(memory_space=pltpu.MemorySpace.SMEM),   # p scalar
                pl.BlockSpec((tile_r, S), lambda i: (i, 0)),
            ],
            out_specs=pl.BlockSpec((tile_r, 1), lambda i: (i, 0)),
            compiler_params=pltpu.CompilerParams(
                dimension_semantics=("parallel",)),
        )(p_arr, xf)
    else:
        kernel = functools.partial(_gem_acc_kernel, eps=eps, clamp=clamp,
                                   inv_s=1.0 / S, p_int=p_int,
                                   s_total=S, tile_s=tile_s)
        out = pl.pallas_call(
            kernel,
            out_shape=jax.ShapeDtypeStruct((R, 1), x.dtype),
            grid=(n_r, n_s),
            in_specs=[
                pl.BlockSpec(memory_space=pltpu.MemorySpace.SMEM),   # p scalar
                pl.BlockSpec((tile_r, tile_s), lambda i, k: (i, k)),
            ],
            out_specs=pl.BlockSpec((tile_r, 1), lambda i, k: (i, 0)),
            scratch_shapes=[pltpu.VMEM((tile_r, 1), jnp.float32)],
            compiler_params=pltpu.CompilerParams(
                dimension_semantics=("parallel", "arbitrary")),
        )(p_arr, xf)

    return out.reshape(N, C)


class GeneralizedMeanPooling:
    """JAX/Pallas equivalent of the mmcls GeneralizedMeanPooling neck."""

    def __init__(self, p: float = 3.0, eps: float = 1e-6, clamp: bool = True):
        assert p >= 1, "'p' must be a value greater then 1"
        # deterministic parameter init: Parameter(torch.ones(1) * p)
        self.p = jnp.ones((1,), dtype=jnp.float32) * p
        self.eps = eps
        self.clamp = clamp

    def __call__(self, inputs):
        if isinstance(inputs, tuple):
            return tuple(gem_pool(x, self.p, self.eps, self.clamp) for x in inputs)
        elif isinstance(inputs, jax.Array):
            return gem_pool(inputs, self.p, self.eps, self.clamp)
        else:
            raise TypeError('neck inputs should be tuple or jax.Array')


def _reference_gem(x, p, eps=1e-6, clamp=True):
    xc = jnp.maximum(x, eps) if clamp else x
    m = jnp.mean(jnp.power(xc.astype(jnp.float32), p), axis=(-2, -1))
    return jnp.power(m, 1.0 / p).astype(x.dtype)


if __name__ == "__main__":
    key = jax.random.PRNGKey(0)
    k1, k2, k3 = jax.random.split(key, 3)

    # 1) small shape through the module API (static p=3 VPU fast path)
    N, C, H, W = 2, 4, 16, 16
    x = jax.random.uniform(k1, (N, C, H, W), dtype=jnp.float32)
    neck = GeneralizedMeanPooling(p=3.0, eps=1e-6, clamp=True)
    out = jax.block_until_ready(neck(x))
    assert out.shape == (N, C), out.shape
    assert jnp.allclose(out, _reference_gem(x, 3.0), atol=1e-4, rtol=1e-4)

    # tuple (multi-scale) path
    outs = jax.block_until_ready(neck((x, x[:, :, :8, :8])))
    assert outs[0].shape == (N, C) and outs[1].shape == (N, C)
    assert jnp.allclose(outs[1], _reference_gem(x[:, :, :8, :8], 3.0),
                        atol=1e-4, rtol=1e-4)

    # 2) multi-tile row grid with uneven last tile + tiny spatial extent (7x7)
    x2 = jax.random.uniform(k2, (2, 100, 7, 7), dtype=jnp.float32)
    out2 = jax.block_until_ready(gem_pool(x2, neck.p, max_tile_r=64))
    assert out2.shape == (2, 100)
    assert jnp.allclose(out2, _reference_gem(x2, 3.0), atol=1e-4, rtol=1e-4)

    # 3) large spatial extent -> accumulator grid over the spatial axis
    x3 = jax.random.uniform(k3, (1, 16, 68, 68), dtype=jnp.float32)
    out3 = jax.block_until_ready(gem_pool(x3, neck.p))
    assert out3.shape == (1, 16)
    assert jnp.allclose(out3, _reference_gem(x3, 3.0), atol=1e-4, rtol=1e-4)

    # 4) non-integer p exercises the dynamic (SMEM-scalar) exponent path
    neck_dyn = GeneralizedMeanPooling(p=3.5)
    out4 = jax.block_until_ready(neck_dyn(x))
    assert jnp.allclose(out4, _reference_gem(x, 3.5), atol=1e-4, rtol=1e-4)

    print("KERNEL_OK")
</pallas_src>

<mosaic_0001>
module attributes {stable_mosaic.version = 11 : i64} {
  func.func @_gem_kernel(%arg0: i32, %arg1: memref<1xf32, #tpu.memory_space<smem>>, %arg2: memref<8x256xf32, #tpu.memory_space<vmem>>, %arg3: memref<8x1xf32, #tpu.memory_space<vmem>>) attributes {dimension_semantics = [#tpu.dimension_semantics<parallel>], iteration_bounds = array<i64: 1>, scalar_prefetch = 0 : i64, scratch_operands = 0 : i64, tpu.core_type = #tpu.core_type<tc>, window_params = [{transform_indices = @transform_0, window_bounds = array<i64: 1>}, {transform_indices = @transform_1, window_bounds = array<i64: 8, 256>}, {transform_indices = @transform_2, window_bounds = array<i64: 8, 1>}]} {
    %c0 = arith.constant 0 : index
    %c0_0 = arith.constant 0 : index
    %0 = vector.load %arg2[%c0, %c0_0] : memref<8x256xf32, #tpu.memory_space<vmem>>, vector<8x256xf32>
    %cst = arith.constant 9.99999997E-7 : f32
    %1 = vector.broadcast %cst : f32 to vector<8x256xf32>
    %2 = arith.maximumf %0, %1 : vector<8x256xf32>
    %3 = arith.mulf %2, %2 : vector<8x256xf32>
    %4 = arith.mulf %2, %3 : vector<8x256xf32>
    %cst_1 = arith.constant dense<0.000000e+00> : vector<8xf32>
    %5 = vector.multi_reduction <add>, %4, %cst_1 [1] : vector<8x256xf32> to vector<8xf32>
    %6 = vector.shape_cast %5 : vector<8xf32> to vector<8x1xf32>
    %cst_2 = arith.constant 3.906250e-03 : f32
    %7 = vector.broadcast %cst_2 : f32 to vector<8x1xf32>
    %8 = arith.mulf %6, %7 : vector<8x1xf32>
    %cst_3 = arith.constant 0.333333343 : f32
    %9 = vector.broadcast %cst_3 : f32 to vector<8x1xf32>
    %10 = math.powf %8, %9 : vector<8x1xf32>
    %c0_4 = arith.constant 0 : index
    %c0_5 = arith.constant 0 : index
    %11 = vector.load %arg3[%c0_4, %c0_5] : memref<8x1xf32, #tpu.memory_space<vmem>>, vector<8x1xf32>
    tpu.vector_store %arg3[%c0_4, %c0_5], %10 {strides = array<i32>} : memref<8x1xf32, #tpu.memory_space<vmem>>, vector<8x1xf32>,
    return
  }
  func.func @transform_0(%arg0: i32) -> i32 {
    %c0_i32 = arith.constant 0 : i32
    %c0_i32_0 = arith.constant 0 : i32
    return %c0_i32 : i32
  }
  func.func @transform_1(%arg0: i32) -> (i32, i32) {
    %c0_i32 = arith.constant 0 : i32
    %c0_i32_0 = arith.constant 0 : i32
    return %arg0, %c0_i32 : i32, i32
  }
  func.func @transform_2(%arg0: i32) -> (i32, i32) {
    %c0_i32 = arith.constant 0 : i32
    %c0_i32_0 = arith.constant 0 : i32
    return %arg0, %c0_i32 : i32, i32
  }
}

</mosaic_0001>

<bundles_post_ra>
// kernel: tpu_custom_call.1
= control target key start
LH: loop header
LB: loop body
LE: loop exit
PB: predicated region body
PF: predicated region fallthrough
CT: control target
= control target key end

     0   :  { %8 = vsyncpa [#allocation4], 0  ;;  %s91_s9 = smov [#allocation3]   ;;  %s122_s0 = inlined_call_operand.<no memory space> [shape: f32[1], index: 0, kind: input, shape index: {}]   ;;  %s123_s1 = inlined_call_operand.hbm [shape: f32[8,256], index: 1, kind: input, shape index: {}]   ;;  %s124_s2 = inlined_call_operand.vmem [shape: f32[8,1], index: 2, kind: output, shape index: {}]  }
   0x1   :  { %s17_s10 = sshll.u32 %s91_s9, 4  ;;  %s67_s13 = scalar_lea.hbm %s123_s1, 256  ;;  %s18_s10 = int_to_ptr.vmem [resolvable:$true] %s17_s10 }
   0x2   :  { %p68_p0 = scmp.ne.s32.totalorder %s123_s1, %s67_s13  ;;  %p71_p1 = scmp.lt.u32.totalorder %s67_s13, %s123_s1 }
   0x4   :  { %p73_p2 = pnand %p71_p1, %p68_p0 }
   0x6   :  { %76 = shalt.err (!%p73_p2)
}
   0x7   :  { %s77_s17 = scalar_lea.vmem %s18_s10, 256  ;;  %p82_p4 = scmp.lt.s32.totalorder %s18_s10, %s18_s10 }
   0x8   :  { %p78_p3 = scmp.ne.s32.totalorder %s18_s10, %s77_s17  ;;  %p83_p5 = scmp.lt.s32.totalorder %s77_s17, %s77_s17 }
   0xa   :  { %p84_p6 = por %p83_p5, %p82_p4 }
   0xc   :  { %p85_p7 = pnand %p84_p6, %p78_p3 }
   0xe   :  { %88 = shalt.err (!%p85_p7)
}
   0xf   :  { %20 = dma.hbm_to_vmem [thread:$0]  %s123_s1, 256, %s18_s10, [#allocation4]  }
  0x10   :  { %89 = dma.done.wait [#allocation4], 256  }
  0x11   :  { %90 = vsyncadd [#allocation4], 4294967040  ;;  %v24_v0 = vld [vmem:[#allocation3] sm:$0xff]  ;;  %v25_v1 = vld [vmem:[#allocation3 + $0x8] sm:$0xff]  ;;  %vm37_vm4 = vcmask 7168  }
  0x12   :  { %v26_v2 = vmax.f32 %v24_v0, 1e-06  ;;  %v27_v3 = vmax.f32 %v25_v1, 1e-06 }
  0x14   :  { %v28_v4 = vmul.f32 %v26_v2, %v26_v2  ;;  %v29_v5 = vmul.f32 %v27_v3, %v27_v3 }
  0x16   :  { %v30_v6 = vmul.f32 %v28_v4, %v26_v2  ;;  %v31_v7 = vmul.f32 %v29_v5, %v27_v3 }
  0x18   :  { %v32_v8 = vadd.f32 %v31_v7, %v30_v6 }
  0x1a   :  { %33 = vadd.xlane.f32.xlu0 %v32_v8 }
  0xa7   :  { %v34_v9 = vpop.xlane.xlu0 %33 }
  0xa8   :  { %v35_v10 = vmul.f32 0.00390625, %v34_v9 }
  0xaa   :  { %v46_v11 = vand.u32 2147483647, %v35_v10  ;;  %v50_v14 = vand.u32 2147483648, %v35_v10  ;;  %vm45_vm2 = vcmp.lt.f32.partialorder %v35_v10, 0.0  ;;  %vm44_vm3 = vcmp.eq.f32.partialorder %v35_v10, 0.0 }
  0xac   :  { %63 = vlog2.f32 %v46_v11  ;;  %vm54_vm0 = vweird.f32 %v46_v11  ;;  %vm56_vm1 = vcmp.eq.f32.partialorder %v46_v11, 0.0  ;;  %vm47_vm5 = vcmp.eq.f32.partialorder %v46_v11, inf }
  0xb6   :  { %v64_v12 = vpop.eup %63 }
  0xb7   :  { %v51_v13 = vmul.f32 0.33333334, %v64_v12 }
  0xb9   :  { %65 = vpow2.f32 %v51_v13 }
  0xc3   :  { %v66_v15 = vpop.eup %65 }
  0xc4   :  { %v53_v16 = vor.u32 %v66_v15, %v50_v14 }
  0xc6   :  { %v55_v17 = vsel %vm54_vm0, %v35_v10, %v53_v16 }
  0xc7   :  { %v58_v18 = vsel %vm56_vm1, %v50_v14, %v55_v17 }
  0xc8   :  { %v59_v19 = vsel %vm45_vm2, nan, %v58_v18 }
  0xc9   :  { %v60_v20 = vsel %vm44_vm3, 0.0, %v59_v19 }
  0xca   :  { %v61_v21 = vsel %vm47_vm5, inf, %v60_v20 }
  0xcb   :  { %38 = vst.msk [vmem:[%s124_s2] sm:$0xff] %vm37_vm4, %v61_v21 }
  0xcc   :  { %43 = vsyncpa [#allocation4], 1 }

</bundles_post_ra>
